<compile_context>
chip_gen: v7x
topology: tpu7x:2x2x1
jax: 0.10.0
libtpu: 0.0.40
codegen_flags: <defaults>
</compile_context>

<pallas_src>
import functools

import jax
import jax.numpy as jnp
from jax import lax
from jax.experimental import pallas as pl
from jax.experimental.pallas import tpu as pltpu

_LANE = 128


def _cdiv(a, b):
    return -(-a // b)


def _round_up(a, m):
    return _cdiv(a, m) * m


def _budgets():
    """(per-block budget bytes, scoped-VMEM limit bytes), per TPU generation.
    v5e/v6e have 128 MiB physical VMEM -> larger blocks amortize per-step
    overhead; v7x has only 64 MiB per TensorCore -> stay lean."""
    try:
        cap = int(pltpu.get_tpu_info().vmem_capacity_bytes)
    except Exception:
        cap = 0
    if cap >= 100 * 1024 * 1024:                     # v5e / v6e (128 MiB)
        return 10 * 1024 * 1024, 64 * 1024 * 1024
    if cap > 0:                                      # v7x-class (64 MiB / TC)
        return 6 * 1024 * 1024, 48 * 1024 * 1024
    return 4 * 1024 * 1024, 32 * 1024 * 1024         # unknown: conservative


def _pick_batch_tile(batch, bytes_per_image, budget):
    """Largest batch tile within the block budget.  Keeps >= 2 grid steps when
    batch >= 2 (DMA overlap + both v7x TensorCores busy) and prefers an even
    grid length (perfect 2-core balance on v7x) as long as that does not shrink
    the block by more than 2x.  The grid is ragged (cdiv), so bt need not
    divide batch (no collapse to bt=1 for prime batches)."""
    max_bt = max(1, budget // max(1, bytes_per_image))
    bt = int(min(max_bt, batch))
    if batch < 2 or bt <= 1:
        return max(1, bt)
    bt = min(bt, _cdiv(batch, 2))                    # keep the grid >= 2 steps
    for cand in range(bt, max(1, bt // 2) - 1, -1):  # prefer an even grid len
        if _cdiv(batch, cand) % 2 == 0:
            return cand
    return bt


# ----------------------------------------------------------------------------
# Fused path: one pass over x (pool -> excitation -> scale).
# ----------------------------------------------------------------------------
def _se_fused_kernel(x_ref, w1t_ref, b1_ref, w2t_ref, b2_ref, o_ref, *, inv_hw):
    # x_ref / o_ref: (bt, C, HW)  w1t_ref: (C, Cr)  b1_ref: (1, Cr)
    # w2t_ref: (Cr, C)            b2_ref: (1, C)
    # Squeeze: f32-accumulated lane-axis sum -> exact mean (read #1 of x_ref).
    y = jnp.sum(x_ref[...], axis=2, dtype=jnp.float32) * inv_hw            # (bt, C)
    # Excitation: Linear -> LeakyReLU(0.2) -> Linear -> Tanh  (M = bt rows).
    h = jnp.dot(y, w1t_ref[...], preferred_element_type=jnp.float32) + b1_ref[...]
    h = jnp.where(h > 0, h, 0.2 * h)
    s = jnp.tanh(jnp.dot(h, w2t_ref[...], preferred_element_type=jnp.float32)
                 + b2_ref[...])                                            # (bt, C)
    # Scale: re-index x_ref (no full-tile VMEM temp), multiply in native dtype.
    o_ref[...] = x_ref[...] * s.astype(o_ref.dtype)[:, :, None]


def _se_fused(x, w1t, b1r, w2t, b2r, *, budget, vmem_limit):
    B, C, HW = x.shape
    Cr = w1t.shape[1]
    dtype = x.dtype

    bt = _pick_batch_tile(B, C * HW * dtype.itemsize, budget)
    grid = (_cdiv(B, bt),)

    kernel = functools.partial(_se_fused_kernel, inv_hw=1.0 / HW)
    return pl.pallas_call(
        kernel,
        out_shape=jax.ShapeDtypeStruct((B, C, HW), dtype),
        grid_spec=pltpu.PrefetchScalarGridSpec(
            num_scalar_prefetch=0,
            grid=grid,
            in_specs=[
                pl.BlockSpec((bt, C, HW), lambda b: (b, 0, 0)),
                pl.BlockSpec((C, Cr), lambda b: (0, 0)),
                pl.BlockSpec((1, Cr), lambda b: (0, 0)),
                pl.BlockSpec((Cr, C), lambda b: (0, 0)),
                pl.BlockSpec((1, C), lambda b: (0, 0)),
            ],
            out_specs=pl.BlockSpec((bt, C, HW), lambda b: (b, 0, 0)),
        ),
        compiler_params=pltpu.CompilerParams(
            dimension_semantics=("parallel",),
            vmem_limit_bytes=vmem_limit,
        ),
    )(x, w1t, b1r, w2t, b2r)


# ----------------------------------------------------------------------------
# Fallback path (single image exceeds the block budget): pool kernel with a
# spatially-tiled "arbitrary" axis + VMEM accumulator, then a scale kernel.
# ----------------------------------------------------------------------------
def _se_pool_kernel(x_ref, w1t_ref, b1_ref, w2t_ref, b2_ref, gate_ref, acc_ref,
                    *, inv_hw, hw, hw_tile, needs_mask):
    s = pl.program_id(1)

    @pl.when(s == 0)
    def _():
        acc_ref[...] = jnp.zeros_like(acc_ref)

    xt = x_ref[...]                                            # (bt, C, hw_tile)
    if needs_mask:
        lane = lax.broadcasted_iota(jnp.int32, x_ref.shape, 2)
        xt = jnp.where(s * hw_tile + lane < hw, xt, 0)
    acc_ref[...] += jnp.sum(xt, axis=2, dtype=jnp.float32)      # (bt, C)

    @pl.when(s == pl.num_programs(1) - 1)
    def _():
        y = acc_ref[...] * inv_hw                               # exact mean
        h = jnp.dot(y, w1t_ref[...], preferred_element_type=jnp.float32) + b1_ref[...]
        h = jnp.where(h > 0, h, 0.2 * h)
        g = jnp.tanh(jnp.dot(h, w2t_ref[...], preferred_element_type=jnp.float32)
                     + b2_ref[...])                             # (bt, C)
        gate_ref[...] = g[:, :, None]                           # (bt, C, 1) f32


def _se_scale_kernel(x_ref, gate_ref, o_ref):
    # x_ref / o_ref: (bt, C, hw_tile)   gate_ref: (bt, C, 1)
    o_ref[...] = x_ref[...] * gate_ref[...].astype(o_ref.dtype)


def _se_two_pass(x, w1t, b1r, w2t, b2r, *, budget, vmem_limit):
    B, C, HW = x.shape
    Cr = w1t.shape[1]
    dtype = x.dtype
    itemsize = dtype.itemsize

    # Lane-dense spatial tile within the budget; one image per batch block.
    hw_tile = max(_LANE, (budget // max(1, C * itemsize)) // _LANE * _LANE)
    hw_tile = min(hw_tile, _round_up(HW, _LANE))
    ns = _cdiv(HW, hw_tile)
    bt = 1
    # TODO(synk): if C alone is so large that a (C, 128) tile exceeds the
    # budget, a channel-tiled pool pass would be needed; the oversized block is
    # accepted as-is here.

    pool_kernel = functools.partial(
        _se_pool_kernel, inv_hw=1.0 / HW, hw=HW, hw_tile=hw_tile,
        needs_mask=(HW % hw_tile) != 0)

    gate = pl.pallas_call(
        pool_kernel,
        out_shape=jax.ShapeDtypeStruct((B, C, 1), jnp.float32),
        grid_spec=pltpu.PrefetchScalarGridSpec(
            num_scalar_prefetch=0,
            grid=(B // bt, ns),
            in_specs=[
                pl.BlockSpec((bt, C, hw_tile), lambda b, s: (b, 0, s)),
                pl.BlockSpec((C, Cr), lambda b, s: (0, 0)),
                pl.BlockSpec((1, Cr), lambda b, s: (0, 0)),
                pl.BlockSpec((Cr, C), lambda b, s: (0, 0)),
                pl.BlockSpec((1, C), lambda b, s: (0, 0)),
            ],
            out_specs=pl.BlockSpec((bt, C, 1), lambda b, s: (b, 0, 0)),
            scratch_shapes=[pltpu.VMEM((bt, C), jnp.float32)],
        ),
        compiler_params=pltpu.CompilerParams(
            dimension_semantics=("parallel", "arbitrary"),
            vmem_limit_bytes=vmem_limit,
        ),
    )(x, w1t, b1r, w2t, b2r)

    out = pl.pallas_call(
        _se_scale_kernel,
        out_shape=jax.ShapeDtypeStruct((B, C, HW), dtype),
        grid_spec=pltpu.PrefetchScalarGridSpec(
            num_scalar_prefetch=0,
            grid=(B // bt, ns),
            in_specs=[
                pl.BlockSpec((bt, C, hw_tile), lambda b, s: (b, 0, s)),
                pl.BlockSpec((bt, C, 1), lambda b, s: (b, 0, 0)),
            ],
            out_specs=pl.BlockSpec((bt, C, hw_tile), lambda b, s: (b, 0, s)),
        ),
        compiler_params=pltpu.CompilerParams(
            dimension_semantics=("parallel", "parallel"),
            vmem_limit_bytes=vmem_limit,
        ),
    )(x, gate)
    return out


# ----------------------------------------------------------------------------
# Public wrapper.
# ----------------------------------------------------------------------------
def se_layer(x_nchw, w1, b1, w2, b2, *, block_budget_bytes=None):
    """SELayer forward.  x_nchw: (B, C, H, W).  w1: (Cr, C), b1: (Cr,),
    w2: (C, Cr), b2: (C,) — same convention as torch.nn.Linear weights."""
    B, C, H, W = x_nchw.shape
    HW = H * W
    Cr = w1.shape[0]

    budget, vmem_limit = _budgets()
    if block_budget_bytes is not None:
        budget = int(block_budget_bytes)

    # (B, C, HW) layout — no spatial padding (the kernel block's last dim is the
    # full HW, so odd HW only costs a masked partial-lane store, not extra HBM
    # passes for pad/slice).
    x = x_nchw.reshape(B, C, HW)

    # Pre-transpose weights so the kernels do plain row-major matmuls.
    w1t = jnp.transpose(w1)            # (C, Cr)
    w2t = jnp.transpose(w2)            # (Cr, C)
    b1r = b1.reshape(1, Cr)
    b2r = b2.reshape(1, C)

    bytes_per_image = C * HW * x.dtype.itemsize
    if bytes_per_image <= budget:
        out = _se_fused(x, w1t, b1r, w2t, b2r, budget=budget, vmem_limit=vmem_limit)
    else:
        out = _se_two_pass(x, w1t, b1r, w2t, b2r, budget=budget, vmem_limit=vmem_limit)
    return out.reshape(B, C, H, W)


def _reference(x, w1, b1, w2, b2):
    # Pure-JAX reference matching the PyTorch forward.
    y = jnp.mean(x, axis=(2, 3))                                  # (B, C)
    h = y @ w1.T + b1
    h = jnp.where(h > 0, h, 0.2 * h)
    s = jnp.tanh(h @ w2.T + b2)                                   # (B, C)
    return x * s[:, :, None, None]


if __name__ == "__main__":
    key = jax.random.PRNGKey(0)

    C, reduction = 8, 4
    Cr = C // reduction

    kx, k1, k2, k3, k4 = jax.random.split(key, 5)
    bound1 = 1.0 / (C ** 0.5)
    bound2 = 1.0 / (Cr ** 0.5)
    w1 = jax.random.uniform(k1, (Cr, C), minval=-bound1, maxval=bound1, dtype=jnp.float32)
    b1 = jax.random.uniform(k2, (Cr,), minval=-bound1, maxval=bound1, dtype=jnp.float32)
    w2 = jax.random.uniform(k3, (C, Cr), minval=-bound2, maxval=bound2, dtype=jnp.float32)
    b2 = jax.random.uniform(k4, (C,), minval=-bound2, maxval=bound2, dtype=jnp.float32)

    se = jax.jit(se_layer, static_argnames=("block_budget_bytes",))

    cases = [
        # (B, C, H, W), forced block budget (None -> auto)
        ((2, C, 16, 16), None),   # lane-dense HW=256, fused path
        ((3, C, 10, 10), None),   # HW=100 (masked store), ragged batch grid
        ((2, C, 13, 20), 2048),   # forces the two-pass (pool + scale) fallback
    ]

    ok = True
    for shape, budget in cases:
        kx, sub = jax.random.split(kx)
        x = jax.random.normal(sub, shape, dtype=jnp.float32)
        out = jax.block_until_ready(se(x, w1, b1, w2, b2, block_budget_bytes=budget))
        ref = _reference(x, w1, b1, w2, b2)
        ok = ok and out.shape == x.shape
        ok = ok and bool(jnp.allclose(out, ref, atol=1e-5, rtol=1e-5))

    assert ok, "mismatch vs reference"
    print("KERNEL_OK")
</pallas_src>

<mosaic_0001>
module attributes {stable_mosaic.version = 11 : i64} {
  func.func @_se_fused_kernel(%arg0: i32, %arg1: memref<1x8x256xf32, #tpu.memory_space<vmem>>, %arg2: memref<8x2xf32, #tpu.memory_space<vmem>>, %arg3: memref<1x2xf32, #tpu.memory_space<vmem>>, %arg4: memref<2x8xf32, #tpu.memory_space<vmem>>, %arg5: memref<1x8xf32, #tpu.memory_space<vmem>>, %arg6: memref<1x8x256xf32, #tpu.memory_space<vmem>>) attributes {dimension_semantics = [#tpu.dimension_semantics<parallel>], iteration_bounds = array<i64: 2>, scalar_prefetch = 0 : i64, scratch_operands = 0 : i64, tpu.core_type = #tpu.core_type<tc>, window_params = [{transform_indices = @transform_0, window_bounds = array<i64: 1, 8, 256>}, {pipeline_mode = #tpu.pipeline_mode<synchronous>, transform_indices = @transform_1, window_bounds = array<i64: 8, 2>}, {pipeline_mode = #tpu.pipeline_mode<synchronous>, transform_indices = @transform_2, window_bounds = array<i64: 1, 2>}, {pipeline_mode = #tpu.pipeline_mode<synchronous>, transform_indices = @transform_3, window_bounds = array<i64: 2, 8>}, {pipeline_mode = #tpu.pipeline_mode<synchronous>, transform_indices = @transform_4, window_bounds = array<i64: 1, 8>}, {transform_indices = @transform_5, window_bounds = array<i64: 1, 8, 256>}]} {
    %c0 = arith.constant 0 : index
    %c0_0 = arith.constant 0 : index
    %c0_1 = arith.constant 0 : index
    %0 = vector.load %arg1[%c0, %c0_0, %c0_1] : memref<1x8x256xf32, #tpu.memory_space<vmem>>, vector<1x8x256xf32>
    %cst = arith.constant dense<0.000000e+00> : vector<1x8xf32>
    %1 = vector.multi_reduction <add>, %0, %cst [2] : vector<1x8x256xf32> to vector<1x8xf32>
    %cst_2 = arith.constant 3.906250e-03 : f32
    %2 = vector.broadcast %cst_2 : f32 to vector<1x8xf32>
    %3 = arith.mulf %1, %2 : vector<1x8xf32>
    %c0_3 = arith.constant 0 : index
    %c0_4 = arith.constant 0 : index
    %4 = vector.load %arg2[%c0_3, %c0_4] : memref<8x2xf32, #tpu.memory_space<vmem>>, vector<8x2xf32>
    %cst_5 = arith.constant dense<0.000000e+00> : vector<1x2xf32>
    %5 = tpu.matmul %3, %4, %cst_5 {dimension_numbers = #tpu.dot_dimension_numbers<[1], [0], [0], [1], [0, 0, 1, 1], [], []>} : vector<1x8xf32>, vector<8x2xf32>, vector<1x2xf32> -> vector<1x2xf32>
    %c0_6 = arith.constant 0 : index
    %c0_7 = arith.constant 0 : index
    %6 = vector.load %arg3[%c0_6, %c0_7] : memref<1x2xf32, #tpu.memory_space<vmem>>, vector<1x2xf32>
    %7 = arith.addf %5, %6 : vector<1x2xf32>
    %cst_8 = arith.constant 0.000000e+00 : f32
    %8 = vector.broadcast %cst_8 : f32 to vector<1x2xf32>
    %9 = arith.cmpf ogt, %7, %8 : vector<1x2xf32>
    %cst_9 = arith.constant 2.000000e-01 : f32
    %10 = vector.broadcast %cst_9 : f32 to vector<1x2xf32>
    %11 = arith.mulf %10, %7 : vector<1x2xf32>
    %12 = arith.select %9, %7, %11 : vector<1x2xi1>, vector<1x2xf32>
    %c0_10 = arith.constant 0 : index
    %c0_11 = arith.constant 0 : index
    %13 = vector.load %arg4[%c0_10, %c0_11] : memref<2x8xf32, #tpu.memory_space<vmem>>, vector<2x8xf32>
    %cst_12 = arith.constant dense<0.000000e+00> : vector<1x8xf32>
    %14 = tpu.matmul %12, %13, %cst_12 {dimension_numbers = #tpu.dot_dimension_numbers<[1], [0], [0], [1], [0, 0, 1, 1], [], []>} : vector<1x2xf32>, vector<2x8xf32>, vector<1x8xf32> -> vector<1x8xf32>
    %c0_13 = arith.constant 0 : index
    %c0_14 = arith.constant 0 : index
    %15 = vector.load %arg5[%c0_13, %c0_14] : memref<1x8xf32, #tpu.memory_space<vmem>>, vector<1x8xf32>
    %16 = arith.addf %14, %15 : vector<1x8xf32>
    %17 = math.tanh %16 : vector<1x8xf32>
    %c0_15 = arith.constant 0 : index
    %c0_16 = arith.constant 0 : index
    %c0_17 = arith.constant 0 : index
    %18 = vector.load %arg1[%c0_15, %c0_16, %c0_17] : memref<1x8x256xf32, #tpu.memory_space<vmem>>, vector<1x8x256xf32>
    %19 = vector.shape_cast %17 : vector<1x8xf32> to vector<1x8x1xf32>
    %20 = vector.broadcast %19 : vector<1x8x1xf32> to vector<1x8x256xf32>
    %21 = arith.mulf %18, %20 : vector<1x8x256xf32>
    %c0_18 = arith.constant 0 : index
    %c0_19 = arith.constant 0 : index
    %c0_20 = arith.constant 0 : index
    %22 = vector.load %arg6[%c0_18, %c0_19, %c0_20] : memref<1x8x256xf32, #tpu.memory_space<vmem>>, vector<1x8x256xf32>
    tpu.vector_store %arg6[%c0_18, %c0_19, %c0_20], %21 {strides = array<i32>} : memref<1x8x256xf32, #tpu.memory_space<vmem>>, vector<1x8x256xf32>,
    return
  }
  func.func @transform_0(%arg0: i32) -> (i32, i32, i32) {
    %c0_i32 = arith.constant 0 : i32
    %c0_i32_0 = arith.constant 0 : i32
    %c0_i32_1 = arith.constant 0 : i32
    return %arg0, %c0_i32, %c0_i32_0 : i32, i32, i32
  }
  func.func @transform_1(%arg0: i32) -> (i32, i32) {
    %c0_i32 = arith.constant 0 : i32
    %c0_i32_0 = arith.constant 0 : i32
    %c0_i32_1 = arith.constant 0 : i32
    return %c0_i32, %c0_i32_0 : i32, i32
  }
  func.func @transform_2(%arg0: i32) -> (i32, i32) {
    %c0_i32 = arith.constant 0 : i32
    %c0_i32_0 = arith.constant 0 : i32
    %c0_i32_1 = arith.constant 0 : i32
    return %c0_i32, %c0_i32_0 : i32, i32
  }
  func.func @transform_3(%arg0: i32) -> (i32, i32) {
    %c0_i32 = arith.constant 0 : i32
    %c0_i32_0 = arith.constant 0 : i32
    %c0_i32_1 = arith.constant 0 : i32
    return %c0_i32, %c0_i32_0 : i32, i32
  }
  func.func @transform_4(%arg0: i32) -> (i32, i32) {
    %c0_i32 = arith.constant 0 : i32
    %c0_i32_0 = arith.constant 0 : i32
    %c0_i32_1 = arith.constant 0 : i32
    return %c0_i32, %c0_i32_0 : i32, i32
  }
  func.func @transform_5(%arg0: i32) -> (i32, i32, i32) {
    %c0_i32 = arith.constant 0 : i32
    %c0_i32_0 = arith.constant 0 : i32
    %c0_i32_1 = arith.constant 0 : i32
    return %arg0, %c0_i32, %c0_i32_0 : i32, i32, i32
  }
}

</mosaic_0001>

<bundles_post_ra>
// kernel: se_layer.1
= control target key start
LH: loop header
LB: loop body
LE: loop exit
PB: predicated region body
PF: predicated region fallthrough
CT: control target
= control target key end

     0   :  { %s545_s18 = smov 0   ;;  %s581_s0 = inlined_call_operand.vmem [shape: f32[2,8,256], index: 0, kind: input, shape index: {}]   ;;  %s582_s1 = inlined_call_operand.vmem [shape: f32[8,2], index: 1, kind: input, shape index: {}]   ;;  %s583_s2 = inlined_call_operand.vmem [shape: f32[1,2], index: 2, kind: input, shape index: {}]   ;;  %s584_s3 = inlined_call_operand.vmem [shape: f32[2,8], index: 3, kind: input, shape index: {}]   ;;  %s585_s4 = inlined_call_operand.vmem [shape: f32[1,8], index: 4, kind: input, shape index: {}]   ;;  %s586_s5 = inlined_call_operand.vmem [shape: f32[2,8,256], index: 5, kind: output, shape index: {}]  }
   0x1 LB: > { %s463_s19 = sadd.s32 4294967295, %s511_s18   ;;  %p467_p0 = scmp.ge.s32.totalorder %s511_s18, 1  ;;  %s511_s18 = sphi %s545_s18, %s15_s18  }
   0x2   : > { %p187_p1 = scmp.lt.s32.totalorder %s511_s18, 3 }
   0x4   : > { %p188_p2 = pnand %p467_p0, %p187_p1 }
   0x5   : > { %p215_p3 = scmp.lt.s32.totalorder (!%p188_p2), %s463_s19, 1  ;;  %v513_v3 = vmov (!%p188_p2), 0.0   ;;  %v231_v4 = vld [vmem:[%s582_s1] sm:$0xff] (!%p188_p2)  ;;  %vm514_vm0 = vmmov (!%p188_p2), 0   ;;  %v234_v5 = vlaneseq (!%p188_p2)  ;;  %vm240_vm1 = vcmask (!%p188_p2), 64512  }
   0x6   : > { %191 = sbr.rel (%p188_p2) target bundleno = 727 (0x2d7), region = 40  ;;  %483 = vmatprep.subr.mxu0 (!%p188_p2), %v513_v3  ;;  %488 = vmatprep.subr.mxu1 (!%p188_p2), %v513_v3  ;;  %v316_v12 = vld [vmem:[%s584_s3] sm:$0x3] (!%p188_p2)  ;;  %vm322_vm2 = vcmask (!%p188_p2), 1041408   ;;  %vm318_vm4 = vcmask (!%p188_p2), 15360  }
   0x7   : > { %484 = vmatpush3.msra.mxu0 (!%p188_p2), %v231_v4  ;;  %485 = vmatprep.mubr.msk.f32.mxu0 (!%p188_p2), %vm514_vm0, %v513_v3  ;;  %v235_v6 = vand.u32 (!%p188_p2), 127, %v234_v5  ;;  %v237_v7 = vshrl.u32 (!%p188_p2), %v234_v5, 7  ;;  %v232_v13 = vld [vmem:[%s583_s2] sm:$0x1] (!%p188_p2) }
   0x8   : > { %490 = vmatprep.mubr.msk.f32.mxu1 (!%p188_p2), %vm514_vm0, %v513_v3  ;;  %489 = vmatpush3.msk.msra.mxu1 (!%p188_p2), %vm322_vm2, %v316_v12  ;;  %v317_v19 = vld [vmem:[%s585_s4] sm:$0x1] (!%p188_p2) }
   0x9   : > { %v238_v8 = vsub.s32 (!%p188_p2), %v235_v6, %v237_v7  ;;  %v399_v23 = vsub.s32 (!%p188_p2), 0, %v237_v7 }
   0xd   : > { %s588_s19 = smov (!%p215_p3, %s463_s19), 1 }
   0xe   : > { %s477_s20 = sshll.u32 %s588_s19, 4 }
   0xf   : > { %s219_s23 = scalar_lea.vmem %s581_s0, %s477_s20  ;;  %s224_s9 = scalar_lea.vmem %s586_s5, %s477_s20 }
  0x10   : > { %v225_v0 = vld [vmem:[%s219_s23] sm:$0xff]  ;;  %v226_v1 = vld [vmem:[%s219_s23 + $0x8] sm:$0xff] }
  0x11   : > { %v227_v2 = vadd.f32 %v226_v1, %v225_v0 }
  0x13   : > { %228 = vadd.xlane.f32.xlu0 %v227_v2 }
  0xa0   : > { %v229_v9 = vpop.xlane.xlu0 %228 }
  0xa1   : > { %v230_v10 = vmul.f32 0.00390625, %v229_v9 }
  0xa3   : > { %v239_v11 = vrot.slane %v230_v10, %v238_v8 }
  0xa5   : > { %486 = vmatmul.mubr.msk.f32.vlgmr.msra.gmra.mrb[0].mxu0 %vm240_vm1, %v239_v11 }
 0x178   : > { %v309_v14 = vpop.f32.mrb[0].mxu0 }
 0x179   : > { %v310_v15 = vadd.f32 %v309_v14, %v232_v13  ;;  %v487_v16 = vpop.f32.mrb[1].mxu0 }
 0x17b   : > { %vm313_vm3 = vcmp.gt.f32.partialorder %v310_v15, 0.0  ;;  %v314_v17 = vmul.f32 0.2, %v310_v15 }
 0x17d   : > { %v315_v18 = vsel %vm313_vm3, %v310_v15, %v314_v17 }
 0x17e   : > { %491 = vmatmul.mubr.msk.f32.vlgmr.msra.gmra.mrb[0].mxu1 %vm318_vm4, %v315_v18 }
 0x251   : > { %v392_v20 = vpop.f32.mrb[0].mxu1 }
 0x252   : > { %v393_v21 = vadd.f32 %v392_v20, %v317_v19  ;;  %v492_v22 = vpop.f32.mrb[1].mxu1 }
 0x254   : > { %503 = vtanh.f32 %v393_v21 }
 0x25e   : > { %v504_v24 = vpop.eup %503 }
 0x25f   : > { %v400_v25 = vrot.slane %v504_v24, %v399_v23 }
 0x261   : > { %402 = vbcast.lane.b32.xlu0 %v400_v25, 256 }
 0x2d3   : > { %v403_v26 = vpop.permute.xlu0 %402 }
 0x2d4   : > { %v404_v27 = vmul.f32 %v403_v26, %v225_v0  ;;  %v405_v28 = vmul.f32 %v403_v26, %v226_v1 }
 0x2d6   : > { %406 = vst [vmem:[%s224_s9] sm:$0xff] %v404_v27  ;;  %407 = vst [vmem:[%s224_s9 + $0x8] sm:$0xff] %v405_v28 }
 0x2d7 PF: > { %s15_s18 = sadd.s32 1, %s511_s18  }
 0x2d8   : > { %p12_p4 = scmp.ge.s32.totalorder %s15_s18, 4  }
 0x2da   :  { %14 = sbr.rel (!%p12_p4) target bundleno = 1 (0x1), region = 70 }

</bundles_post_ra>
